<compile_context>
chip_gen: v5e
topology: v5e:2x2
jax: 0.10.0
libtpu: 0.0.40
codegen_flags: <defaults>
</compile_context>

<pallas_src>
import jax
import jax.numpy as jnp
from jax.experimental import pallas as pl
from jax.experimental.pallas import tpu as pltpu

_NEG_INF = -1e30
_VMEM_LIMIT = 48 * 1024 * 1024  # fits the scoped budget on v5e/v6e/v7x


# ----------------------------------------------------------------------------
# Plain-JAX glue: im2col + weight flattening
# ----------------------------------------------------------------------------
def _flatten_conv_weight(w):
    """(Cout, Cin, k0, k1, k2) -> (Cout, k0*k1*k2*Cin), tap-major / cin-minor."""
    cout, cin, k0, k1, k2 = w.shape
    return jnp.transpose(w, (0, 2, 3, 4, 1)).reshape(cout, k0 * k1 * k2 * cin)


def _im2col_full3(x, dilation):
    """3x3x3 dilated taps, 'same' padding.  x: (B, Cin, H, W, D) -> (B, 27*Cin, N)."""
    B, Cin, H, W, D = x.shape
    p = dilation
    xp = jnp.pad(x, ((0, 0), (0, 0), (p, p), (p, p), (p, p)))
    cols = []
    for t0 in range(3):
        for t1 in range(3):
            for t2 in range(3):
                cols.append(xp[:, :,
                               t0 * dilation:t0 * dilation + H,
                               t1 * dilation:t1 * dilation + W,
                               t2 * dilation:t2 * dilation + D])
    cols = jnp.stack(cols, axis=1)          # (B, 27, Cin, H, W, D)
    return cols.reshape(B, 27 * Cin, H * W * D)


def _im2col_axis3(x, axis):
    """Size-3 taps along one spatial axis (2, 3 or 4), 'same' padding."""
    B, Cin, H, W, D = x.shape
    pads = [(0, 0)] * 5
    pads[axis] = (1, 1)
    xp = jnp.pad(x, pads)
    ext = x.shape[axis]
    cols = []
    for t in range(3):
        idx = [slice(None)] * 5
        idx[axis] = slice(t, t + ext)
        cols.append(xp[tuple(idx)])
    cols = jnp.stack(cols, axis=1)          # (B, 3, Cin, H, W, D)
    return cols.reshape(B, 3 * Cin, H * W * D)


def _pick_tile(n, max_tile=512):
    """Largest lane tile <= max_tile that divides n (prefers multiples of 128)."""
    if n <= max_tile:
        return n
    for t in range(max_tile, 127, -128):
        if n % t == 0:
            return t
    return n


# ----------------------------------------------------------------------------
# Pallas kernel 1: per-branch dilated 3x3x3 conv (BN folded) + sigmoid gate
# ----------------------------------------------------------------------------
def _branch_kernel(cols_ref, grp_ref, w_ref, b_ref, out_ref):
    cols = cols_ref[0, 0]                   # (27*Cg, TN) bf16
    w = w_ref[0]                            # (Cg, 27*Cg) bf16 (BN-folded)
    y = jnp.dot(w, cols, preferred_element_type=jnp.float32)
    y = y + b_ref[0]                        # (Cg, 1) folded conv+BN bias (f32)
    gate = jax.nn.sigmoid(y)
    out_ref[0, 0] = (gate * grp_ref[0, 0]).astype(out_ref.dtype)


def branch_gate(cols, grp, w_fold, b_fold, tn):
    nb, B, K, N = cols.shape
    cg = grp.shape[2]
    nt = N // tn
    return pl.pallas_call(
        _branch_kernel,
        out_shape=jax.ShapeDtypeStruct((nb, B, cg, N), jnp.float32),
        grid=(nb, B, nt),
        in_specs=[
            pl.BlockSpec((1, 1, K, tn), lambda i, j, n: (i, j, 0, n)),
            pl.BlockSpec((1, 1, cg, tn), lambda i, j, n: (i, j, 0, n)),
            pl.BlockSpec((1, cg, K), lambda i, j, n: (i, 0, 0)),   # per-branch weights
            pl.BlockSpec((1, cg, 1), lambda i, j, n: (i, 0, 0)),
        ],
        out_specs=pl.BlockSpec((1, 1, cg, tn), lambda i, j, n: (i, j, 0, n)),
        compiler_params=pltpu.CompilerParams(
            dimension_semantics=("parallel", "parallel", "parallel"),
            vmem_limit_bytes=_VMEM_LIMIT),
    )(cols, grp, w_fold, b_fold)


# ----------------------------------------------------------------------------
# Pallas kernel 2: Q/K/V 1-D convs as bf16 matmuls (1/sqrt(C) folded into Q)
# ----------------------------------------------------------------------------
def _qkv_kernel(qc_ref, kc_ref, vc_ref, wq_ref, wk_ref, wv_ref,
                bq_ref, bk_ref, bv_ref, q_ref, k_ref, v_ref):
    q = jnp.dot(wq_ref[...], qc_ref[0], preferred_element_type=jnp.float32) + bq_ref[...]
    k = jnp.dot(wk_ref[...], kc_ref[0], preferred_element_type=jnp.float32) + bk_ref[...]
    v = jnp.dot(wv_ref[...], vc_ref[0], preferred_element_type=jnp.float32) + bv_ref[...]
    q_ref[0] = q.astype(q_ref.dtype)
    k_ref[0] = k.astype(k_ref.dtype)
    v_ref[0] = v.astype(v_ref.dtype)


def qkv_convs(qc, kc, vc, wq, wk, wv, bq, bk, bv, tn):
    B, K3, npad = qc.shape
    C = wq.shape[0]
    nt = npad // tn
    col_spec = pl.BlockSpec((1, K3, tn), lambda b, t: (b, 0, t))
    w_spec = pl.BlockSpec((C, K3), lambda b, t: (0, 0))
    b_spec = pl.BlockSpec((C, 1), lambda b, t: (0, 0))
    out_spec = pl.BlockSpec((1, C, tn), lambda b, t: (b, 0, t))
    out_sds = jax.ShapeDtypeStruct((B, C, npad), jnp.bfloat16)
    return pl.pallas_call(
        _qkv_kernel,
        out_shape=(out_sds, out_sds, out_sds),
        grid=(B, nt),
        in_specs=[col_spec, col_spec, col_spec,
                  w_spec, w_spec, w_spec,
                  b_spec, b_spec, b_spec],
        out_specs=[out_spec, out_spec, out_spec],
        compiler_params=pltpu.CompilerParams(
            dimension_semantics=("parallel", "parallel"),
            vmem_limit_bytes=_VMEM_LIMIT),
    )(qc, kc, vc, wq, wk, wv, bq, bk, bv)


# ----------------------------------------------------------------------------
# Pallas kernel 3: flash-style spatial self-attention (+ residual add)
# ----------------------------------------------------------------------------
def _flash_kernel(q_ref, k_ref, v_ref, kb_ref, ms_ref, o_ref, m_sc, l_sc, acc_sc):
    ki = pl.program_id(2)

    @pl.when(ki == 0)
    def _():
        m_sc[...] = jnp.full_like(m_sc, _NEG_INF)
        l_sc[...] = jnp.zeros_like(l_sc)
        acc_sc[...] = jnp.zeros_like(acc_sc)

    q = q_ref[0]                            # (C, TQ) bf16, already scaled by 1/sqrt(C)
    k = k_ref[0]                            # (C, TK) bf16
    # s[t, j] = sum_c K[c, t] * Q[c, j]  ==  (Q^T K)^T  -> TQ stays on the lane axis
    s = jax.lax.dot_general(k, q, (((0,), (0,)), ((), ())),
                            preferred_element_type=jnp.float32)
    s = s + kb_ref[...]                     # additive -1e30 mask on padded keys

    m_prev = m_sc[...]
    m_new = jnp.maximum(m_prev, jnp.max(s, axis=0, keepdims=True))   # (1, TQ)
    alpha = jnp.exp(m_prev - m_new)
    p = jnp.exp(s - m_new)                                           # (TK, TQ)
    l_sc[...] = alpha * l_sc[...] + jnp.sum(p, axis=0, keepdims=True)
    acc_sc[...] = alpha * acc_sc[...] + jnp.dot(
        v_ref[0], p.astype(v_ref.dtype), preferred_element_type=jnp.float32)
    m_sc[...] = m_new

    @pl.when(ki == pl.num_programs(2) - 1)
    def _():
        inv_l = pl.reciprocal(l_sc[...], approx=True)
        o_ref[0] = (ms_ref[0] + acc_sc[...] * inv_l).astype(o_ref.dtype)


def flash_attention(q, k, v, kbias, ms, tq, tk):
    B, C, npad = ms.shape
    nq = npad // tq
    nk = npad // tk
    return pl.pallas_call(
        _flash_kernel,
        out_shape=jax.ShapeDtypeStruct((B, C, npad), jnp.float32),
        grid=(B, nq, nk),
        in_specs=[
            pl.BlockSpec((1, C, tq), lambda b, qi, ki: (b, 0, qi)),   # q
            pl.BlockSpec((1, C, tk), lambda b, qi, ki: (b, 0, ki)),   # k
            pl.BlockSpec((1, C, tk), lambda b, qi, ki: (b, 0, ki)),   # v
            pl.BlockSpec((tk, 1), lambda b, qi, ki: (ki, 0)),         # key mask bias
            pl.BlockSpec((1, C, tq), lambda b, qi, ki: (b, 0, qi)),   # residual
        ],
        out_specs=pl.BlockSpec((1, C, tq), lambda b, qi, ki: (b, 0, qi)),
        scratch_shapes=[
            pltpu.VMEM((1, tq), jnp.float32),   # running max
            pltpu.VMEM((1, tq), jnp.float32),   # running sum
            pltpu.VMEM((C, tq), jnp.float32),   # output accumulator
        ],
        compiler_params=pltpu.CompilerParams(
            dimension_semantics=("parallel", "parallel", "arbitrary"),
            vmem_limit_bytes=_VMEM_LIMIT),
    )(q, k, v, kbias, ms)


# ----------------------------------------------------------------------------
# Parameters + forward
# ----------------------------------------------------------------------------
def init_safe_params(key, in_channels, rates=(1, 2, 3, 5)):
    cg = in_channels // 4
    C = in_channels
    keys = jax.random.split(key, 16)
    p = {"rates": rates}
    p["branch_w"] = jnp.stack(
        [jax.random.normal(keys[i], (cg, cg, 3, 3, 3), jnp.float32) * 0.1 for i in range(4)])
    p["branch_b"] = jnp.stack(
        [jax.random.normal(keys[4 + i], (cg,), jnp.float32) * 0.1 for i in range(4)])
    # BatchNorm3d defaults (eval mode)
    p["bn_gamma"] = jnp.ones((4, cg), jnp.float32)
    p["bn_beta"] = jnp.zeros((4, cg), jnp.float32)
    p["bn_mean"] = jnp.zeros((4, cg), jnp.float32)
    p["bn_var"] = jnp.ones((4, cg), jnp.float32)
    p["wq"] = jax.random.normal(keys[8], (C, C, 3, 1, 1), jnp.float32) * 0.1
    p["wk"] = jax.random.normal(keys[9], (C, C, 1, 3, 1), jnp.float32) * 0.1
    p["wv"] = jax.random.normal(keys[10], (C, C, 1, 1, 3), jnp.float32) * 0.1
    p["bq"] = jax.random.normal(keys[11], (C,), jnp.float32) * 0.1
    p["bk"] = jax.random.normal(keys[12], (C,), jnp.float32) * 0.1
    p["bv"] = jax.random.normal(keys[13], (C,), jnp.float32) * 0.1
    return p


def safe_forward(params, x):
    B, C, H, W, D = x.shape
    cg = C // 4
    N = H * W * D
    eps = 1e-5
    rates = params["rates"]

    # ---- multi-scale gated branches (BN folded into conv weights) --------
    bn_scale = params["bn_gamma"] / jnp.sqrt(params["bn_var"] + eps)      # (4, cg)
    bn_shift = params["bn_beta"] - params["bn_mean"] * bn_scale
    w_flat = jnp.stack([_flatten_conv_weight(params["branch_w"][i]) for i in range(4)], 0)
    w_fold = (w_flat * bn_scale[:, :, None]).astype(jnp.bfloat16)         # (4, cg, 27cg)
    b_fold = (params["branch_b"] * bn_scale + bn_shift)[:, :, None]       # (4, cg, 1) f32

    groups = jnp.split(x, 4, axis=1)                                      # 4 x (B, cg, H, W, D)
    # TODO(synk): fuse the 27-tap generation into the kernel (shifted matmuls on
    # the padded group tile) to fully remove im2col read amplification; bf16
    # columns halve the HBM traffic in the meantime.
    cols = jnp.stack([_im2col_full3(groups[i], rates[i]) for i in range(4)], 0)
    cols = cols.astype(jnp.bfloat16)                                      # (4, B, 27cg, N)
    grp = jnp.stack([g.reshape(B, cg, N) for g in groups], 0)             # (4, B, cg, N) f32

    gated = branch_gate(cols, grp, w_fold, b_fold, _pick_tile(N))         # (4, B, cg, N)
    multi_scale = jnp.transpose(gated, (1, 0, 2, 3)).reshape(B, C, N)
    ms5 = multi_scale.reshape(B, C, H, W, D)

    # ---- Q/K/V convs + flash spatial attention ----------------------------
    scale = 1.0 / (C ** 0.5)                                              # folded into Q
    wq = (_flatten_conv_weight(params["wq"]) * scale).astype(jnp.bfloat16)
    wk = _flatten_conv_weight(params["wk"]).astype(jnp.bfloat16)
    wv = _flatten_conv_weight(params["wv"]).astype(jnp.bfloat16)
    bq = (params["bq"] * scale)[:, None]
    bk = params["bk"][:, None]
    bv = params["bv"][:, None]

    qc = _im2col_axis3(ms5, 2).astype(jnp.bfloat16)   # q_conv: kernel (3,1,1)
    kc = _im2col_axis3(ms5, 3).astype(jnp.bfloat16)   # k_conv: kernel (1,3,1)
    vc = _im2col_axis3(ms5, 4).astype(jnp.bfloat16)   # v_conv: kernel (1,1,3)

    # pad the flattened spatial axis to a multiple of the attention tile
    if N <= 256:
        tq = tk = N
        npad = N
    else:
        tq = tk = 256
        npad = ((N + 255) // 256) * 256
    if npad != N:
        pad = ((0, 0), (0, 0), (0, npad - N))
        qc, kc, vc = jnp.pad(qc, pad), jnp.pad(kc, pad), jnp.pad(vc, pad)
        ms_p = jnp.pad(multi_scale, pad)
    else:
        ms_p = multi_scale
    kbias = jnp.where(jnp.arange(npad) < N, 0.0, _NEG_INF).astype(jnp.float32)[:, None]

    q, k, v = qkv_convs(qc, kc, vc, wq, wk, wv, bq, bk, bv, tq)           # (B, C, npad) bf16
    out = flash_attention(q, k, v, kbias, ms_p, tq, tk)                   # (B, C, npad) f32
    return out[:, :, :N].reshape(B, C, H, W, D)


# ----------------------------------------------------------------------------
# Pure-JAX reference (for correctness check)
# ----------------------------------------------------------------------------
def safe_reference(params, x):
    B, C, H, W, D = x.shape
    eps = 1e-5
    rates = params["rates"]
    dn = ("NCDHW", "OIDHW", "NCDHW")
    groups = jnp.split(x, 4, axis=1)
    outs = []
    for i, r in enumerate(rates):
        y = jax.lax.conv_general_dilated(groups[i], params["branch_w"][i],
                                         window_strides=(1, 1, 1),
                                         padding=[(r, r)] * 3,
                                         rhs_dilation=(r, r, r),
                                         dimension_numbers=dn)
        y = y + params["branch_b"][i][None, :, None, None, None]
        sc = params["bn_gamma"][i] / jnp.sqrt(params["bn_var"][i] + eps)
        sh = params["bn_beta"][i] - params["bn_mean"][i] * sc
        y = y * sc[None, :, None, None, None] + sh[None, :, None, None, None]
        outs.append(jax.nn.sigmoid(y) * groups[i])
    ms = jnp.concatenate(outs, axis=1)

    def conv(w, b, pad):
        y = jax.lax.conv_general_dilated(ms, w, (1, 1, 1),
                                         [(pad[0], pad[0]), (pad[1], pad[1]), (pad[2], pad[2])],
                                         dimension_numbers=dn)
        return y + b[None, :, None, None, None]

    Q = conv(params["wq"], params["bq"], (1, 0, 0)).reshape(B, C, -1)
    K = conv(params["wk"], params["bk"], (0, 1, 0)).reshape(B, C, -1)
    V = conv(params["wv"], params["bv"], (0, 0, 1)).reshape(B, C, -1)
    att = jax.nn.softmax(jnp.einsum("bcn,bcm->bnm", Q, K) / (C ** 0.5), axis=-1)
    feat = jnp.einsum("bnm,bcm->bcn", att, V)
    return ms + feat.reshape(B, C, H, W, D)


if __name__ == "__main__":
    key = jax.random.PRNGKey(0)
    kx, kp = jax.random.split(key)
    B, C, H, W, D = 2, 8, 4, 4, 4          # in_channels=8 -> 4 groups of 2
    x = jax.random.normal(kx, (B, C, H, W, D), jnp.float32)
    params = init_safe_params(kp, C)

    out = jax.block_until_ready(safe_forward(params, x))
    ref = safe_reference(params, x)

    assert out.shape == (B, C, H, W, D)
    max_err = float(jnp.max(jnp.abs(out - ref)))
    # bf16 MXU operands + approx reciprocal => a couple of 1e-3 of drift vs f32 ref
    assert jnp.allclose(out, ref, atol=2e-2, rtol=2e-2), max_err
    print("KERNEL_OK")
</pallas_src>

<mosaic_0001>
module attributes {stable_mosaic.version = 11 : i64} {
  func.func @_branch_kernel(%arg0: i32, %arg1: i32, %arg2: i32, %arg3: memref<1x1x54x64xbf16, #tpu.memory_space<vmem>>, %arg4: memref<1x1x2x64xf32, #tpu.memory_space<vmem>>, %arg5: memref<1x2x54xbf16, #tpu.memory_space<vmem>>, %arg6: memref<1x2x1xf32, #tpu.memory_space<vmem>>, %arg7: memref<1x1x2x64xf32, #tpu.memory_space<vmem>>) attributes {dimension_semantics = [#tpu.dimension_semantics<parallel>, #tpu.dimension_semantics<parallel>, #tpu.dimension_semantics<parallel>], iteration_bounds = array<i64: 4, 2, 1>, scalar_prefetch = 0 : i64, scratch_operands = 0 : i64, tpu.core_type = #tpu.core_type<tc>, window_params = [{transform_indices = @transform_0, window_bounds = array<i64: 1, 1, 54, 64>}, {transform_indices = @transform_1, window_bounds = array<i64: 1, 1, 2, 64>}, {transform_indices = @transform_2, window_bounds = array<i64: 1, 2, 54>}, {transform_indices = @transform_3, window_bounds = array<i64: 1, 2, 1>}, {transform_indices = @transform_4, window_bounds = array<i64: 1, 1, 2, 64>}]} {
    %c0 = arith.constant 0 : index
    %c0_0 = arith.constant 0 : index
    %c0_1 = arith.constant 0 : index
    %c0_2 = arith.constant 0 : index
    %0 = vector.load %arg3[%c0, %c0_0, %c0_1, %c0_2] : memref<1x1x54x64xbf16, #tpu.memory_space<vmem>>, vector<1x1x54x64xbf16>
    %1 = vector.shape_cast %0 : vector<1x1x54x64xbf16> to vector<54x64xbf16>
    %c0_3 = arith.constant 0 : index
    %c0_4 = arith.constant 0 : index
    %c0_5 = arith.constant 0 : index
    %2 = vector.load %arg5[%c0_3, %c0_4, %c0_5] : memref<1x2x54xbf16, #tpu.memory_space<vmem>>, vector<1x2x54xbf16>
    %3 = vector.shape_cast %2 : vector<1x2x54xbf16> to vector<2x54xbf16>
    %cst = arith.constant dense<0.000000e+00> : vector<2x64xf32>
    %4 = tpu.matmul %3, %1, %cst {dimension_numbers = #tpu.dot_dimension_numbers<[1], [0], [0], [1], [0, 0, 1, 1], [], []>} : vector<2x54xbf16>, vector<54x64xbf16>, vector<2x64xf32> -> vector<2x64xf32>
    %c0_6 = arith.constant 0 : index
    %c0_7 = arith.constant 0 : index
    %c0_8 = arith.constant 0 : index
    %5 = vector.load %arg6[%c0_6, %c0_7, %c0_8] : memref<1x2x1xf32, #tpu.memory_space<vmem>>, vector<1x2x1xf32>
    %6 = vector.shape_cast %5 : vector<1x2x1xf32> to vector<2x1xf32>
    %7 = vector.broadcast %6 : vector<2x1xf32> to vector<2x64xf32>
    %8 = arith.addf %4, %7 : vector<2x64xf32>
    %9 = arith.negf %8 : vector<2x64xf32>
    %10 = math.exp %9 : vector<2x64xf32>
    %cst_9 = arith.constant 1.000000e+00 : f32
    %11 = vector.broadcast %cst_9 : f32 to vector<2x64xf32>
    %12 = arith.addf %11, %10 : vector<2x64xf32>
    %13 = arith.divf %11, %12 : vector<2x64xf32>
    %c0_10 = arith.constant 0 : index
    %c0_11 = arith.constant 0 : index
    %c0_12 = arith.constant 0 : index
    %c0_13 = arith.constant 0 : index
    %14 = vector.load %arg4[%c0_10, %c0_11, %c0_12, %c0_13] : memref<1x1x2x64xf32, #tpu.memory_space<vmem>>, vector<1x1x2x64xf32>
    %15 = vector.shape_cast %14 : vector<1x1x2x64xf32> to vector<2x64xf32>
    %16 = arith.mulf %13, %15 : vector<2x64xf32>
    %c0_14 = arith.constant 0 : index
    %c0_15 = arith.constant 0 : index
    %c0_16 = arith.constant 0 : index
    %c0_17 = arith.constant 0 : index
    %17 = vector.load %arg7[%c0_14, %c0_15, %c0_16, %c0_17] : memref<1x1x2x64xf32, #tpu.memory_space<vmem>>, vector<1x1x2x64xf32>
    %18 = vector.shape_cast %17 : vector<1x1x2x64xf32> to vector<2x64xf32>
    %19 = vector.shape_cast %16 : vector<2x64xf32> to vector<1x1x2x64xf32>
    tpu.vector_store %arg7[%c0_14, %c0_15, %c0_16, %c0_17], %19 {strides = array<i32>} : memref<1x1x2x64xf32, #tpu.memory_space<vmem>>, vector<1x1x2x64xf32>,
    return
  }
  func.func @transform_0(%arg0: i32, %arg1: i32, %arg2: i32) -> (i32, i32, i32, i32) {
    %c0_i32 = arith.constant 0 : i32
    %c0_i32_0 = arith.constant 0 : i32
    return %arg0, %arg1, %c0_i32, %arg2 : i32, i32, i32, i32
  }
  func.func @transform_1(%arg0: i32, %arg1: i32, %arg2: i32) -> (i32, i32, i32, i32) {
    %c0_i32 = arith.constant 0 : i32
    %c0_i32_0 = arith.constant 0 : i32
    return %arg0, %arg1, %c0_i32, %arg2 : i32, i32, i32, i32
  }
  func.func @transform_2(%arg0: i32, %arg1: i32, %arg2: i32) -> (i32, i32, i32) {
    %c0_i32 = arith.constant 0 : i32
    %c0_i32_0 = arith.constant 0 : i32
    %c0_i32_1 = arith.constant 0 : i32
    return %arg0, %c0_i32, %c0_i32_0 : i32, i32, i32
  }
  func.func @transform_3(%arg0: i32, %arg1: i32, %arg2: i32) -> (i32, i32, i32) {
    %c0_i32 = arith.constant 0 : i32
    %c0_i32_0 = arith.constant 0 : i32
    %c0_i32_1 = arith.constant 0 : i32
    return %arg0, %c0_i32, %c0_i32_0 : i32, i32, i32
  }
  func.func @transform_4(%arg0: i32, %arg1: i32, %arg2: i32) -> (i32, i32, i32, i32) {
    %c0_i32 = arith.constant 0 : i32
    %c0_i32_0 = arith.constant 0 : i32
    return %arg0, %arg1, %c0_i32, %arg2 : i32, i32, i32, i32
  }
}

</mosaic_0001>

<bundles_post_ra>
// kernel: tpu_custom_call.1
= control target key start
LH: loop header
LB: loop body
LE: loop exit
PB: predicated region body
PF: predicated region fallthrough
CT: control target
= control target key end

     0   :  { %9 = vsyncpa [#allocation3], 0  ;;  %s917_s0 = inlined_call_operand.vmem [shape: bf16[4,2,54,64], index: 0, kind: input, shape index: {}]   ;;  %s918_s1 = inlined_call_operand.vmem [shape: f32[4,2,2,64], index: 1, kind: input, shape index: {}]   ;;  %s919_s2 = inlined_call_operand.vmem [shape: bf16[4,2,54], index: 2, kind: input, shape index: {}]   ;;  %s920_s3 = inlined_call_operand.vmem [shape: f32[4,2,1], index: 3, kind: input, shape index: {}]   ;;  %s921_s4 = inlined_call_operand.hbm [shape: f32[4,2,2,64], index: 4, kind: output, shape index: {}]  }
   0x1   :  { %11 = vsyncpa [#allocation3 + $0x1], 0  ;;  %s779_s15 = smov 0   ;;  %s781_s16 = smov 0  }
   0x2   :  { %s783_s17 = smov 0   ;;  %s785_s18 = smov 0  }
   0x3   :  { %s787_s19 = smov 0   ;;  %s789_s20 = smov 0  }
   0x4   :  { %s791_s21 = smov 0   ;;  %s793_s22 = smov 0  }
   0x5 LB: > { %s546_s23 = sadd.s32 4294967295, %s751_s22   ;;  %s547_s24 = sadd.s32 4294967294, %s751_s22   ;;  %s751_s22 = sphi %s793_s22, %s17_s22   ;;  %s747_s21 = sphi %s791_s21, %s933_s21   ;;  %s743_s20 = sphi %s789_s20, %s932_s20   ;;  %s739_s19 = sphi %s787_s19, %s931_s19   ;;  %s735_s18 = sphi %s785_s18, %s930_s18   ;;  %s731_s17 = sphi %s783_s17, %s929_s17   ;;  %s727_s16 = sphi %s781_s16, %s928_s16   ;;  %s723_s15 = sphi %s779_s15, %s927_s15  }
   0x6   : > { %s32_s25 = sadd.s32 1, %s743_s20  ;;  %s36_s26 = sadd.s32 1, %s747_s21 }
   0x7   : > { %p34_p0 = scmp.ge.s32.totalorder %s32_s25, 2  ;;  %p169_p1 = scmp.ne.s32.totalorder %s731_s17, %s727_s16 }
   0x8   : > { %p170_p2 = scmp.eq.s32.totalorder %s546_s23, 7  ;;  %p175_p5 = scmp.ne.s32.totalorder %s727_s16, %s723_s15 }
   0x9   : > { %s935_s25 = smov (%p34_p0, %s32_s25), 0  ;;  %s937_s26 = smov (!%p34_p0, %s36_s26), %s747_s21 }
   0xa   : > { %s153_s27 = ssub.s32 %s743_s20, %s935_s25  ;;  %p830_p3 = por %p170_p2, %p169_p1 }
   0xb   : > { %p38_p4 = scmp.ge.s32.totalorder %s937_s26, 4  ;;  %p176_p6 = scmp.eq.s32.totalorder %s547_s24, 7 }
   0xc   : > { %p550_p7 = scmp.ge.s32.totalorder %s751_s22, 1  ;;  %p236_p9 = scmp.lt.s32.totalorder %s751_s22, 9 }
   0xd   : > { %s939_s26 = smov (%p38_p4, %s937_s26), 0  ;;  %p839_p8 = por %p176_p6, %p175_p5 }
   0xe   : > { %924 = sst [smem:[#allocation5_spill]] %s939_s26  ;;  %s152_s30 = ssub.s32 %s747_s21, %s939_s26 }
   0xf   : > { %s159_s5 = sadd.s32 1, %s731_s17  ;;  %s154_s6 = sor.u32 %s153_s27, %s152_s30 }
  0x10   : > { %p237_p10 = pnand %p550_p7, %p236_p9  ;;  %p157_p11 = scmp.eq.s32.totalorder %s154_s6, 0 }
  0x11   : > { %p287_p12 = scmp.lt.s32.totalorder (!%p237_p10), %s739_s19, 3  ;;  %p289_p13 = scmp.lt.s32.totalorder (!%p237_p10), %s735_s18, 1 }
  0x12   : > { %s848_s7 = scalar_select %p157_p11, %s731_s17, %s159_s5  }
  0x13   : > { %240 = sbr.rel (%p237_p10) target bundleno = 214 (0xd6), region = 36 }
  0x18   : > { %v753_v0 = vmov 0   ;;  %s288_s8 = scalar_select %p287_p12, %s739_s19, 3  ;;  %vm357_vm0 = vcmask 1042432   ;;  %vm353_vm1 = vcmask 441344   ;;  %vm395_vm6 = vcmask 517120  }
  0x19   : > { %652 = vset.pattern.permute.xlu0 %v753_v0  ;;  %s290_s9 = scalar_select %p289_p13, %s735_s18, 1 }
  0x1a   : > { %s579_s10 = smul.u32 14, %s288_s8  ;;  %s553_s12 = sshll.u32 %s288_s8, 1 }
  0x1b   : > { %s578_s11 = smul.u32 7, %s290_s9  ;;  %s316_s23 = scalar_lea.vmem %s920_s3, %s553_s12 }
  0x1c   : > { %s857_s24 = sadd.s32 %s553_s12, %s290_s9  ;;  %v326_v1 = vld [vmem:[%s316_s23] sm:$0x3]  ;;  %s284_s12 = sand.u32 1, %s727_s16  }
  0x1d   : > { %s296_s27 = sadd.s32 %s579_s10, %s578_s11  ;;  %329 = vperm.xlu0 %652, %v326_v1   ;;  %s312_s11 = scalar_lea.vmem %s919_s2, %s288_s8 }
  0x1e   : > { %s552_s30 = sshll.u32 %s296_s27, 2  ;;  %v325_v9 = vld [vmem:[%s312_s11] sm:$0x1]  ;;  %s554_s8 = sshll.u32 %s857_s24, 1 }
  0x1f   : > { %s298_s26 = scalar_lea.vmem %s917_s0, %s552_s30  ;;  %s551_s14 = sshll.u32 %s284_s12, 1 }
  0x20   : > { %v324_v2 = vld [vmem:[%s298_s26 + $0x18] sm:$0x7]  ;;  %v577_v6 = vld [vmem:[%s298_s26 + $0x10] sm:$0xff]  ;;  %v576_v7 = vld [vmem:[%s298_s26 + $0x8] sm:$0xff]  ;;  %s309_s5 = scalar_lea.vmem %s918_s1, %s554_s8  ;;  %s398_s11 = scalar_lea.sflag [#allocation3], %s284_s12 }
  0x21   : > { %v345_v3 = vunpack.c.l.b16 %v324_v2  ;;  %v575_v8 = vld [vmem:[%s298_s26] sm:$0xff]  ;;  %s571_s26 = sshll.u32 %s739_s19, 1 }
  0x22   : > { %s409_s13 = sadd.s32 %s735_s18, %s571_s26  ;;  %v393_v24 = vld [vmem:[%s309_s5] sm:$0x3]  ;;  %s286_s18 = scalar_lea.vmem [#allocation2], %s551_s14 }
  0x23   : > { %v349_v4 = vpack.c.b16 %v345_v3, %v345_v3  ;;  %s572_s23 = sshll.u32 %s409_s13, 1  ;;  %s413_s24 = sshll.u32 %s286_s18, 4  ;;  %s414_s24 = int_to_ptr.vmem [resolvable:$true] %s413_s24 }
  0x24   : > { %s411_s19 = scalar_lea.hbm %s921_s4, %s572_s23  ;;  %s677_s23 = scalar_lea.hbm %s921_s4, 16 }
  0x25   : > { %v359_v5 = vsel %vm357_vm0, %v349_v4, 0  ;;  %s415_s10 = sshll.u32 %s411_s19, 4  ;;  %s416_s10 = int_to_ptr.hbm [resolvable:$true] %s415_s10 }
  0x26   : > { %365 = vmatpush.bf16.msra.mxu0 %v359_v5  ;;  %s671_s26 = sshra.s32 %s416_s10, 4  ;;  %s672_s26 = int_to_ptr.hbm [resolvable:$true] %s671_s26 }
  0x27   : > { %s673_s13 = scalar_lea.hbm %s672_s26, 2  ;;  %p678_p4 = scmp.lt.s32.totalorder %s672_s26, %s921_s4 }
  0x28   : > { %p674_p0 = scmp.ne.s32.totalorder %s672_s26, %s673_s13  ;;  %p679_p5 = scmp.lt.s32.totalorder %s677_s23, %s673_s13 }
  0x2a   : > { %366 = vmatpush.bf16.msra.mxu0 %v577_v6  ;;  %p675_p1 = pnand %p674_p0, %p830_p3  ;;  %p680_p6 = por %p679_p5, %p678_p4 }
  0x2c   : > { %p676_p2 = pneg %p675_p1 }
  0x2e   : > { %367 = vmatpush.bf16.msra.mxu0 %v576_v7  ;;  %p681_p7 = pnand %p680_p6, %p676_p2 }
  0x32   : > { %368 = vmatpush.bf16.msra.mxu0 %v575_v8 }
  0x35   : > { %568 = vmatmul.msk.bf16.vlgmr.msra.gmra.mxu0 %vm353_vm1, %v325_v9 }
  0x8f   : > { %v330_v10 = vpop.permute.xlu0 %329 }
  0xb2   : > { %v370_v11 = vpop.f32.mrf.mxu0 }
  0xb3   : > { %v371_v12 = vadd.f32 %v370_v11, %v330_v10 }
  0xb5   : > { %v569_v13 = vmul.f32 -1.442695, %v371_v12 }
  0xb7   : > { %653 = vpow2.f32 %v569_v13 }
  0xba   : > { %v372_v14 = vpop.f32.mrf.mxu0 }
  0xbd   : > { %v654_v15 = vpop.eup %653 }
  0xbe   : > { %v377_v16 = vadd.f32 1.0, %v654_v15 }
  0xc0   : > { %655 = vrcp.f32 %v377_v16  ;;  %v389_v20 = vand.u32 2147483648, %v377_v16  ;;  %v387_v22 = vand.u32 2147483647, %v377_v16  ;;  %vm383_vm3 = vweird.f32 %v377_v16 }
  0xc2   : > { %v390_v25 = vor.u32 1.1754944e-38, %v389_v20  ;;  %vm388_vm5 = vcmp.eq.f32.partialorder %v387_v22, 8.507059e+37 }
  0xc6   : > { %v656_v17 = vpop.eup %655 }
  0xc7   : > { %v379_v18 = vmul.f32 %v656_v17, %v377_v16  ;;  %vm384_vm2 = vweird.f32 %v656_v17 }
  0xc8   : > { %vm385_vm4 = vmor %vm383_vm3, %vm384_vm2 }
  0xc9   : > { %v380_v19 = vsub.f32 1.0, %v379_v18 }
  0xcb   : > { %v381_v21 = vmul.f32 %v656_v17, %v380_v19 }
  0xcd   : > { %v382_v23 = vadd.f32 %v656_v17, %v381_v21 }
  0xcf   : > { %v386_v26 = vsel %vm385_vm4, %v656_v17, %v382_v23 }
  0xd0   : > { %v391_v27 = vsel %vm388_vm5, %v390_v25, %v386_v26 }
  0xd1   : > { %v394_v28 = vmul.f32 %v393_v24, %v391_v27 }
  0xd3   : > { %396 = vst.msk [vmem:[%s286_s18] sm:$0x3] %vm395_vm6, %v394_v28 }
  0xd4   : > { %684 = shalt.err (!%p681_p7)
}
  0xd5   : > { %580 = dma.vmem_to_hbm [thread:$0]  (%p830_p3), %s414_s24, 32, %s416_s10, %s398_s11  }
  0xd6 PF: > { %p586_p9 = scmp.ge.s32.totalorder %s751_s22, 2  ;;  %s427_s12 = sand.u32 1, %s723_s15  }
  0xd7   : > { %s428_s5 = scalar_lea.sflag [#allocation3], %s427_s12 }
  0xd8   : > { %p583_p10 = pnand %p586_p9, %p839_p8 }
  0xda   : > { %p584_p11 = pneg %p583_p10 }
  0xdc   : > { %718 = dma.done.wait (%p584_p11), %s428_s5, 32  }
  0xdd   : > { %720 = vsyncadd (%p584_p11), %s428_s5, 4294967264  ;;  %s17_s22 = sadd.s32 1, %s751_s22   ;;  %s926_s28 = sld [smem:[#allocation5_spill]] }
  0xde   : > { %p14_p12 = scmp.ge.s32.totalorder %s17_s22, 10   ;;  %s927_s15 = smov %s727_s16 }
  0xdf   : > { %s928_s16 = smov %s731_s17  ;;  %s929_s17 = smov %s848_s7 }
  0xe0   : > { %s930_s18 = smov %s743_s20  ;;  %s931_s19 = smov %s747_s21 }
  0xe1   : > { %s932_s20 = smov %s935_s25  ;;  %16 = sbr.rel (!%p14_p12) target bundleno = 5 (0x5), region = 80 }
  0xe3   : > { %s933_s21 = smov %s926_s28 }
  0xe6   :  { %434 = vsyncpa [#allocation3], 1 }
  0xe7   :  { %436 = vsyncpa [#allocation3 + $0x1], 1 }

</bundles_post_ra>
